<compile_context>
chip_gen: v5e
topology: v5e:2x2
jax: 0.10.0
libtpu: 0.0.40
codegen_flags: <defaults>
</compile_context>

<pallas_src>
import math
import jax
import jax.numpy as jnp
from jax.experimental import pallas as pl
from jax.experimental.pallas import tpu as pltpu


def cdan_kernel(x_ref, w1_ref, b1_ref, w2_ref, b2_ref, w3p_ref, b3_ref, o_ref):
    # x arrives in its native dtype; in-register cast to bf16 keeps layer 1 on
    # the packed-bf16 MXU path without an extra out-of-kernel HBM pass.
    x = x_ref[...].astype(jnp.bfloat16)                       # (TILE_N, 128)

    # ad_layer1 + ReLU (dropout1 is identity in the eval-mode forward).
    # Downcast as part of the ReLU so the largest intermediate is half-width.
    h1 = jnp.dot(x, w1_ref[...], preferred_element_type=jnp.float32) + b1_ref[...]
    h1 = jnp.maximum(h1, 0.0).astype(jnp.bfloat16)            # (TILE_N, 64)

    # ad_layer2 + ReLU (dropout2 identity in eval mode).
    h2 = jnp.dot(h1, w2_ref[...], preferred_element_type=jnp.float32) + b2_ref[...]
    h2 = jnp.maximum(h2, 0.0).astype(jnp.bfloat16)            # (TILE_N, 16)

    # ad_layer3: contract padded W3 (8x16, row 0 real) against h2's last dim
    # (rhs-transposed dimension numbers) so the result lands lane-dense as
    # (8, TILE_N) instead of a masked (TILE_N, 1) column.
    yt = jax.lax.dot_general(
        w3p_ref[...], h2,
        dimension_numbers=(((1,), (1,)), ((), ())),
        preferred_element_type=jnp.float32)                   # (8, TILE_N)

    b3 = b3_ref[0, 0]                                         # SMEM scalar
    o_ref[...] = jax.nn.sigmoid(yt[0:1, :] + b3)              # (1, TILE_N)


def _select_tile_n(n, *, max_tile_n=8192, min_steps=8):
    """Biggest tile that still leaves >= min_steps grid steps (when N allows).

    Big tiles amortize the ~0.35 us per-grid-step overhead; the cap keeps
    enough steps for v7x's 2-TC megacore split and for input double-buffering
    on v5e/v6e. Always a multiple of 128 (sublane/lane alignment).
    """
    per_step = -(-n // min_steps)                 # ceil(n / min_steps)
    tile = -(-per_step // 128) * 128              # round up to 128
    return max(128, min(max_tile_n, tile))


def cdan_forward(x, params, *, tile_n=None):
    """Forward pass of CDAN_AdversarialNetwork. x: (N, 128) f32/bf16 -> (N, 1) f32."""
    w1, b1, w2, b2, w3, b3 = params
    n = x.shape[0]
    if tile_n is None:
        tile_n = _select_tile_n(n)
    assert tile_n % 128 == 0, "tile_n must be a multiple of 128"
    num_tiles = pl.cdiv(n, tile_n)

    # Tiny (~20 KB) weights: cast to bf16 at the boundary (negligible traffic);
    # x itself is NOT touched outside the kernel (no cast/pad HBM pass).
    w1b = w1.astype(jnp.bfloat16)
    w2b = w2.astype(jnp.bfloat16)
    # Pack W3 (16, 1) into an (8, 16) bf16 block: row 0 = W3^T, rows 1..7 zero.
    w3p = jnp.zeros((8, 16), jnp.bfloat16).at[0, :].set(w3[:, 0].astype(jnp.bfloat16))

    cost = pl.CostEstimate(
        flops=2 * n * (128 * 64 + 64 * 16 + 16),
        transcendentals=n,                                    # sigmoid
        bytes_accessed=n * (128 * jnp.dtype(x.dtype).itemsize + 4) + 20 * 1024,
    )

    out = pl.pallas_call(
        cdan_kernel,
        out_shape=jax.ShapeDtypeStruct((1, n), jnp.float32),
        grid=(num_tiles,),
        in_specs=[
            pl.BlockSpec((tile_n, 128), lambda i: (i, 0)),    # x: streamed per tile (ragged tail masked)
            pl.BlockSpec((128, 64), lambda i: (0, 0)),        # W1: VMEM-resident
            pl.BlockSpec((1, 64), lambda i: (0, 0)),          # b1
            pl.BlockSpec((64, 16), lambda i: (0, 0)),         # W2
            pl.BlockSpec((1, 16), lambda i: (0, 0)),          # b2
            pl.BlockSpec((8, 16), lambda i: (0, 0)),          # W3 (padded, row 0 real)
            pl.BlockSpec(memory_space=pltpu.MemorySpace.SMEM),  # b3: SMEM scalar
        ],
        out_specs=pl.BlockSpec((1, tile_n), lambda i: (0, i)),  # lane-dense slab
        compiler_params=pltpu.CompilerParams(
            dimension_semantics=("parallel",)),
        cost_estimate=cost,
    )(x, w1b, b1, w2b, b2, w3p, b3)

    # Layout plumbing only: (1, N) lane-dense slab -> (N, 1).
    return out.reshape(n, 1)


def reference_forward(x, params):
    # Plain-JAX reference mirroring the kernel numerics (bf16 MXU inputs, f32 accum).
    w1, b1, w2, b2, w3, b3 = params
    xb = x.astype(jnp.bfloat16)
    h1 = jnp.maximum(
        jnp.dot(xb, w1.astype(jnp.bfloat16), preferred_element_type=jnp.float32) + b1, 0.0)
    h2 = jnp.maximum(
        jnp.dot(h1.astype(jnp.bfloat16), w2.astype(jnp.bfloat16),
                preferred_element_type=jnp.float32) + b2, 0.0)
    y = jnp.dot(h2.astype(jnp.bfloat16), w3.astype(jnp.bfloat16),
                preferred_element_type=jnp.float32) + b3
    return jax.nn.sigmoid(y)


def xavier_normal(key, fan_in, fan_out):
    # matches torch.nn.init.xavier_normal_ std = sqrt(2 / (fan_in + fan_out));
    # stored as (in, out) so the kernel computes x @ W.
    std = math.sqrt(2.0 / (fan_in + fan_out))
    return std * jax.random.normal(key, (fan_in, fan_out), dtype=jnp.float32)


def init_params(key):
    k1, k2, k3 = jax.random.split(key, 3)
    w1 = xavier_normal(k1, 128, 64)
    b1 = jnp.zeros((1, 64), jnp.float32)
    w2 = xavier_normal(k2, 64, 16)
    b2 = jnp.zeros((1, 16), jnp.float32)
    w3 = xavier_normal(k3, 16, 1)
    b3 = jnp.zeros((1, 1), jnp.float32)
    return (w1, b1, w2, b2, w3, b3)


if __name__ == "__main__":
    key = jax.random.PRNGKey(0)
    kx, kp = jax.random.split(key)
    params = init_params(kp)

    # 1) Small single (partial) tile: N=8 rows -> one masked 128-row block.
    n_small = 8
    x_small = jax.random.normal(kx, (n_small, 128), dtype=jnp.float32)
    out_small = jax.block_until_ready(cdan_forward(x_small, params))
    ref_small = reference_forward(x_small, params)
    assert out_small.shape == (n_small, 1)
    assert jnp.allclose(out_small, ref_small, atol=2e-3, rtol=2e-3)

    # 2) Multi-tile + ragged tail: 600 rows -> 5 grid steps of 128, last masked.
    n_big = 600
    x_big = jax.random.normal(jax.random.fold_in(kx, 1), (n_big, 128), dtype=jnp.float32)
    out_big = jax.block_until_ready(cdan_forward(x_big, params))
    ref_big = reference_forward(x_big, params)
    assert out_big.shape == (n_big, 1)
    assert jnp.allclose(out_big, ref_big, atol=2e-3, rtol=2e-3)

    print("KERNEL_OK")
</pallas_src>

<mosaic_0001>
module attributes {stable_mosaic.version = 11 : i64} {
  func.func @cdan_kernel(%arg0: i32, %arg1: memref<128x128xf32, #tpu.memory_space<vmem>>, %arg2: memref<128x64xbf16, #tpu.memory_space<vmem>>, %arg3: memref<1x64xf32, #tpu.memory_space<vmem>>, %arg4: memref<64x16xbf16, #tpu.memory_space<vmem>>, %arg5: memref<1x16xf32, #tpu.memory_space<vmem>>, %arg6: memref<8x16xbf16, #tpu.memory_space<vmem>>, %arg7: memref<1x1xf32, #tpu.memory_space<smem>>, %arg8: memref<1x128xf32, #tpu.memory_space<vmem>>) attributes {dimension_semantics = [#tpu.dimension_semantics<parallel>], iteration_bounds = array<i64: 1>, scalar_prefetch = 0 : i64, scratch_operands = 0 : i64, tpu.core_type = #tpu.core_type<tc>, window_params = [{transform_indices = @transform_0, window_bounds = array<i64: 128, 128>}, {pipeline_mode = #tpu.pipeline_mode<synchronous>, transform_indices = @transform_1, window_bounds = array<i64: 128, 64>}, {pipeline_mode = #tpu.pipeline_mode<synchronous>, transform_indices = @transform_2, window_bounds = array<i64: 1, 64>}, {pipeline_mode = #tpu.pipeline_mode<synchronous>, transform_indices = @transform_3, window_bounds = array<i64: 64, 16>}, {pipeline_mode = #tpu.pipeline_mode<synchronous>, transform_indices = @transform_4, window_bounds = array<i64: 1, 16>}, {pipeline_mode = #tpu.pipeline_mode<synchronous>, transform_indices = @transform_5, window_bounds = array<i64: 8, 16>}, {transform_indices = @transform_6, window_bounds = array<i64: 1, 1>}, {transform_indices = @transform_7, window_bounds = array<i64: 1, 128>}]} {
    %c0 = arith.constant 0 : index
    %c0_0 = arith.constant 0 : index
    %0 = vector.load %arg1[%c0, %c0_0] : memref<128x128xf32, #tpu.memory_space<vmem>>, vector<128x128xf32>
    %1 = arith.truncf %0 : vector<128x128xf32> to vector<128x128xbf16>
    %c0_1 = arith.constant 0 : index
    %c0_2 = arith.constant 0 : index
    %2 = vector.load %arg2[%c0_1, %c0_2] : memref<128x64xbf16, #tpu.memory_space<vmem>>, vector<128x64xbf16>
    %cst = arith.constant dense<0.000000e+00> : vector<128x64xf32>
    %3 = tpu.matmul %1, %2, %cst {dimension_numbers = #tpu.dot_dimension_numbers<[1], [0], [0], [1], [0, 0, 1, 1], [], []>} : vector<128x128xbf16>, vector<128x64xbf16>, vector<128x64xf32> -> vector<128x64xf32>
    %c0_3 = arith.constant 0 : index
    %c0_4 = arith.constant 0 : index
    %4 = vector.load %arg3[%c0_3, %c0_4] : memref<1x64xf32, #tpu.memory_space<vmem>>, vector<1x64xf32>
    %5 = vector.broadcast %4 : vector<1x64xf32> to vector<128x64xf32>
    %6 = arith.addf %3, %5 : vector<128x64xf32>
    %cst_5 = arith.constant 0.000000e+00 : f32
    %7 = vector.broadcast %cst_5 : f32 to vector<128x64xf32>
    %8 = arith.maximumf %6, %7 : vector<128x64xf32>
    %9 = arith.truncf %8 : vector<128x64xf32> to vector<128x64xbf16>
    %c0_6 = arith.constant 0 : index
    %c0_7 = arith.constant 0 : index
    %10 = vector.load %arg4[%c0_6, %c0_7] : memref<64x16xbf16, #tpu.memory_space<vmem>>, vector<64x16xbf16>
    %cst_8 = arith.constant dense<0.000000e+00> : vector<128x16xf32>
    %11 = tpu.matmul %9, %10, %cst_8 {dimension_numbers = #tpu.dot_dimension_numbers<[1], [0], [0], [1], [0, 0, 1, 1], [], []>} : vector<128x64xbf16>, vector<64x16xbf16>, vector<128x16xf32> -> vector<128x16xf32>
    %c0_9 = arith.constant 0 : index
    %c0_10 = arith.constant 0 : index
    %12 = vector.load %arg5[%c0_9, %c0_10] : memref<1x16xf32, #tpu.memory_space<vmem>>, vector<1x16xf32>
    %13 = vector.broadcast %12 : vector<1x16xf32> to vector<128x16xf32>
    %14 = arith.addf %11, %13 : vector<128x16xf32>
    %cst_11 = arith.constant 0.000000e+00 : f32
    %15 = vector.broadcast %cst_11 : f32 to vector<128x16xf32>
    %16 = arith.maximumf %14, %15 : vector<128x16xf32>
    %17 = arith.truncf %16 : vector<128x16xf32> to vector<128x16xbf16>
    %c0_12 = arith.constant 0 : index
    %c0_13 = arith.constant 0 : index
    %18 = vector.load %arg6[%c0_12, %c0_13] : memref<8x16xbf16, #tpu.memory_space<vmem>>, vector<8x16xbf16>
    %cst_14 = arith.constant dense<0.000000e+00> : vector<8x128xf32>
    %19 = tpu.matmul %18, %17, %cst_14 {dimension_numbers = #tpu.dot_dimension_numbers<[1], [1], [0], [0], [0, 0, 1, 0], [], []>} : vector<8x16xbf16>, vector<128x16xbf16>, vector<8x128xf32> -> vector<8x128xf32>
    %c0_15 = arith.constant 0 : index
    %c0_16 = arith.constant 0 : index
    %20 = memref.load %arg7[%c0_15, %c0_16] : memref<1x1xf32, #tpu.memory_space<smem>>
    %21 = vector.extract_strided_slice %19 {offsets = [0, 0], sizes = [1, 128], strides = [1, 1]} : vector<8x128xf32> to vector<1x128xf32>
    %22 = vector.broadcast %20 : f32 to vector<1x128xf32>
    %23 = arith.addf %21, %22 : vector<1x128xf32>
    %24 = arith.negf %23 : vector<1x128xf32>
    %25 = math.exp %24 : vector<1x128xf32>
    %cst_17 = arith.constant 1.000000e+00 : f32
    %26 = vector.broadcast %cst_17 : f32 to vector<1x128xf32>
    %27 = arith.addf %26, %25 : vector<1x128xf32>
    %28 = arith.divf %26, %27 : vector<1x128xf32>
    %c0_18 = arith.constant 0 : index
    %c0_19 = arith.constant 0 : index
    %29 = vector.load %arg8[%c0_18, %c0_19] : memref<1x128xf32, #tpu.memory_space<vmem>>, vector<1x128xf32>
    tpu.vector_store %arg8[%c0_18, %c0_19], %28 {strides = array<i32>} : memref<1x128xf32, #tpu.memory_space<vmem>>, vector<1x128xf32>,
    return
  }
  func.func @transform_0(%arg0: i32) -> (i32, i32) {
    %c0_i32 = arith.constant 0 : i32
    %c0_i32_0 = arith.constant 0 : i32
    return %arg0, %c0_i32 : i32, i32
  }
  func.func @transform_1(%arg0: i32) -> (i32, i32) {
    %c0_i32 = arith.constant 0 : i32
    %c0_i32_0 = arith.constant 0 : i32
    %c0_i32_1 = arith.constant 0 : i32
    return %c0_i32, %c0_i32_0 : i32, i32
  }
  func.func @transform_2(%arg0: i32) -> (i32, i32) {
    %c0_i32 = arith.constant 0 : i32
    %c0_i32_0 = arith.constant 0 : i32
    %c0_i32_1 = arith.constant 0 : i32
    return %c0_i32, %c0_i32_0 : i32, i32
  }
  func.func @transform_3(%arg0: i32) -> (i32, i32) {
    %c0_i32 = arith.constant 0 : i32
    %c0_i32_0 = arith.constant 0 : i32
    %c0_i32_1 = arith.constant 0 : i32
    return %c0_i32, %c0_i32_0 : i32, i32
  }
  func.func @transform_4(%arg0: i32) -> (i32, i32) {
    %c0_i32 = arith.constant 0 : i32
    %c0_i32_0 = arith.constant 0 : i32
    %c0_i32_1 = arith.constant 0 : i32
    return %c0_i32, %c0_i32_0 : i32, i32
  }
  func.func @transform_5(%arg0: i32) -> (i32, i32) {
    %c0_i32 = arith.constant 0 : i32
    %c0_i32_0 = arith.constant 0 : i32
    %c0_i32_1 = arith.constant 0 : i32
    return %c0_i32, %c0_i32_0 : i32, i32
  }
  func.func @transform_6(%arg0: i32) -> (i32, i32) {
    %c0_i32 = arith.constant 0 : i32
    %c0_i32_0 = arith.constant 0 : i32
    %c0_i32_1 = arith.constant 0 : i32
    return %c0_i32, %c0_i32_0 : i32, i32
  }
  func.func @transform_7(%arg0: i32) -> (i32, i32) {
    %c0_i32 = arith.constant 0 : i32
    %c0_i32_0 = arith.constant 0 : i32
    return %c0_i32, %arg0 : i32, i32
  }
}

</mosaic_0001>

<bundles_post_ra>
// kernel: tpu_custom_call.1
= control target key start
LH: loop header
LB: loop body
LE: loop exit
PB: predicated region body
PF: predicated region fallthrough
CT: control target
= control target key end

     0   :  { %s680_s0 = inlined_call_operand.vmem [shape: f32[8,128], index: 0, kind: input, shape index: {}]   ;;  %s681_s1 = inlined_call_operand.vmem [shape: bf16[128,64], index: 1, kind: input, shape index: {}]   ;;  %s682_s2 = inlined_call_operand.vmem [shape: f32[1,64], index: 2, kind: input, shape index: {}]   ;;  %s683_s3 = inlined_call_operand.vmem [shape: bf16[64,16], index: 3, kind: input, shape index: {}]   ;;  %s684_s4 = inlined_call_operand.vmem [shape: f32[1,16], index: 4, kind: input, shape index: {}]   ;;  %s685_s5 = inlined_call_operand.vmem [shape: bf16[8,16], index: 5, kind: input, shape index: {}]   ;;  %s686_s6 = inlined_call_operand.<no memory space> [shape: f32[1,1], index: 6, kind: input, shape index: {}]   ;;  %s687_s7 = inlined_call_operand.hbm [shape: f32[1,8], index: 7, kind: output, shape index: {}]  }
   0x1   :  { %v474_v0 = vld [vmem:[%s681_s1 + $0x38] sm:$0xff]  ;;  %v473_v1 = vld [vmem:[%s681_s1 + $0x30] sm:$0xff] }
   0x2   :  { %121 = vmatpush.bf16.msra.mxu0 %v474_v0  ;;  %479 = vmatpush.bf16.msra.mxu3 %v474_v0 }
   0x3   :  { %13 = vsyncpa [#allocation4], 0  ;;  %v472_v2 = vld [vmem:[%s681_s1 + $0x28] sm:$0xff]  ;;  %v471_v3 = vld [vmem:[%s681_s1 + $0x20] sm:$0xff]  ;;  %vm230_vm0 = vcmask 523264   ;;  %vm329_vm1 = vcmask 130048  }
   0x4   :  { %v470_v4 = vld [vmem:[%s681_s1 + $0x18] sm:$0xff]  ;;  %v469_v5 = vld [vmem:[%s681_s1 + $0x10] sm:$0xff]  ;;  %v468_v6 = vld [vmem:[%s681_s1 + $0x8] sm:$0xff] }
   0x5   :  { %v467_v7 = vld [vmem:[%s681_s1] sm:$0xff]  ;;  %v30_v9 = vld [vmem:[%s680_s0 + $0x8] sm:$0xff]  ;;  %v31_v11 = vld [vmem:[%s680_s0 + $0x10] sm:$0xff] }
   0x6   :  { %122 = vmatpush.bf16.msra.mxu0 %v473_v1  ;;  %480 = vmatpush.bf16.msra.mxu3 %v473_v1  ;;  %v29_v8 = vld [vmem:[%s680_s0] sm:$0xff]  ;;  %v32_v12 = vld [vmem:[%s680_s0 + $0x18] sm:$0xff]  ;;  %v34_v15 = vld [vmem:[%s680_s0 + $0x28] sm:$0xff] }
   0x7   :  { %v45_v10 = vpack.c.bf16 %v30_v9, %v29_v8  ;;  %v46_v13 = vpack.c.bf16 %v32_v12, %v31_v11  ;;  %v33_v14 = vld [vmem:[%s680_s0 + $0x20] sm:$0xff]  ;;  %v39_v17 = vld [vmem:[%s680_s0 + $0x50] sm:$0xff]  ;;  %v40_v18 = vld [vmem:[%s680_s0 + $0x58] sm:$0xff] }
   0x8   :  { %v47_v16 = vpack.c.bf16 %v34_v15, %v33_v14  ;;  %v50_v19 = vpack.c.bf16 %v40_v18, %v39_v17  ;;  %v35_v20 = vld [vmem:[%s680_s0 + $0x30] sm:$0xff]  ;;  %v36_v21 = vld [vmem:[%s680_s0 + $0x38] sm:$0xff]  ;;  %v41_v22 = vld [vmem:[%s680_s0 + $0x60] sm:$0xff] }
   0x9   :  { %v42_v23 = vld [vmem:[%s680_s0 + $0x68] sm:$0xff]  ;;  %v48_v24 = vpack.c.bf16 %v36_v21, %v35_v20  ;;  %v37_v26 = vld [vmem:[%s680_s0 + $0x40] sm:$0xff]  ;;  %v43_v28 = vld [vmem:[%s680_s0 + $0x70] sm:$0xff] }
   0xa   :  { %123 = vmatpush.bf16.msra.mxu0 %v472_v2  ;;  %481 = vmatpush.bf16.msra.mxu3 %v472_v2  ;;  %v51_v25 = vpack.c.bf16 %v42_v23, %v41_v22  ;;  %v38_v27 = vld [vmem:[%s680_s0 + $0x48] sm:$0xff]  ;;  %v44_v29 = vld [vmem:[%s680_s0 + $0x78] sm:$0xff]  ;;  %v477_v33 = vld [vmem:[%s683_s3 + $0x10] sm:$0xff] }
   0xb   :  { %v49_v30 = vpack.c.bf16 %v38_v27, %v37_v26  ;;  %v52_v31 = vpack.c.bf16 %v44_v29, %v43_v28  ;;  %v478_v32 = vld [vmem:[%s683_s3 + $0x18] sm:$0xff]  ;;  %v476_v34 = vld [vmem:[%s683_s3 + $0x8] sm:$0xff]  ;;  %v475_v35 = vld [vmem:[%s683_s3] sm:$0xff] }
   0xc   :  { %259 = vmatpush.bf16.msra.mxu1 %v478_v32  ;;  %v488_v37 = vld [vmem:[%s682_s2] ss:$0 sm:$0xff] }
   0xe   :  { %124 = vmatpush.bf16.msra.mxu0 %v471_v3  ;;  %482 = vmatpush.bf16.msra.mxu3 %v471_v3 }
  0x10   :  { %260 = vmatpush.bf16.msra.mxu1 %v477_v33 }
  0x12   :  { %125 = vmatpush.bf16.msra.mxu0 %v470_v4  ;;  %483 = vmatpush.bf16.msra.mxu3 %v470_v4 }
  0x14   :  { %261 = vmatpush.bf16.msra.mxu1 %v476_v34 }
  0x16   :  { %126 = vmatpush.bf16.msra.mxu0 %v469_v5  ;;  %484 = vmatpush.bf16.msra.mxu3 %v469_v5 }
  0x18   :  { %262 = vmatpush.bf16.msra.mxu1 %v475_v35 }
  0x1a   :  { %127 = vmatpush.bf16.msra.mxu0 %v468_v6  ;;  %485 = vmatpush.bf16.msra.mxu3 %v468_v6 }
  0x1e   :  { %128 = vmatpush.bf16.msra.mxu0 %v467_v7  ;;  %486 = vmatpush.bf16.msra.mxu3 %v467_v7 }
  0x21   :  { %129 = vmatmul.bf16.vlgmr.msra.gmra.mxu0 %v45_v10  ;;  %154 = vmatmul.bf16.vlgmr.msra.gmra.mxu3 %v50_v19 }
  0x31   :  { %134 = vmatmul.bf16.gmra.mxu0 %v46_v13  ;;  %159 = vmatmul.bf16.gmra.mxu3 %v51_v25 }
  0x41   :  { %139 = vmatmul.bf16.gmra.mxu0 %v47_v16  ;;  %164 = vmatmul.bf16.gmra.mxu3 %v52_v31 }
  0x51   :  { %144 = vmatmul.bf16.gmra.mxu0 %v48_v24 }
  0x61   :  { %149 = vmatmul.bf16.gmra.mxu0 %v49_v30  ;;  %v489_v30 = vld [vmem:[%s684_s4] ss:$0 sm:$0xff] }
  0x9e   :  { %v130_v36 = vpop.f32.mrf.mxu0 }
  0x9f   :  { %v131_v38 = vadd.f32 %v488_v37, %v130_v36 }
  0xa1   :  { %v170_v41 = vmax.f32 %v131_v38, 0.0 }
  0xa4   :  { %v155_v2 = vpop.f32.mrf.mxu3 }
  0xa5   :  { %v156_v11 = vadd.f32 %v488_v37, %v155_v2 }
  0xa6   :  { %v132_v39 = vpop.f32.mrf.mxu0 }
  0xa7   :  { %v133_v40 = vadd.f32 %v488_v37, %v132_v39  ;;  %v180_v13 = vmax.f32 %v156_v11, 0.0 }
  0xa9   :  { %v171_v42 = vmax.f32 %v133_v40, 0.0 }
  0xab   :  { %v186_v43 = vpack.c.bf16 %v171_v42, %v170_v41 }
  0xac   :  { %v157_v6 = vpop.f32.mrf.mxu3 }
  0xad   :  { %457 = vmatmul.msk.bf16.vlgmr.msra.gmra.mxu1 %vm230_vm0, %v186_v43  ;;  %v158_v12 = vadd.f32 %v488_v37, %v157_v6 }
  0xae   :  { %v135_v44 = vpop.f32.mrf.mxu0 }
  0xaf   :  { %v136_v45 = vadd.f32 %v488_v37, %v135_v44  ;;  %v181_v14 = vmax.f32 %v158_v12, 0.0 }
  0xb1   :  { %v172_v48 = vmax.f32 %v136_v45, 0.0  ;;  %v191_v15 = vpack.c.bf16 %v181_v14, %v180_v13 }
  0xb4   :  { %v160_v10 = vpop.f32.mrf.mxu3 }
  0xb5   :  { %v161_v17 = vadd.f32 %v488_v37, %v160_v10 }
  0xb6   :  { %v137_v46 = vpop.f32.mrf.mxu0 }
  0xb7   :  { %v138_v47 = vadd.f32 %v488_v37, %v137_v46  ;;  %v182_v20 = vmax.f32 %v161_v17, 0.0 }
  0xb9   :  { %v173_v49 = vmax.f32 %v138_v47, 0.0 }
  0xbb   :  { %v187_v50 = vpack.c.bf16 %v173_v49, %v172_v48 }
  0xbc   :  { %v162_v16 = vpop.f32.mrf.mxu3 }
  0xbd   :  { %458 = vmatmul.msk.bf16.gmra.mxu1 %vm230_vm0, %v187_v50  ;;  %v163_v18 = vadd.f32 %v488_v37, %v162_v16 }
  0xbe   :  { %v140_v51 = vpop.f32.mrf.mxu0 }
  0xbf   :  { %v141_v52 = vadd.f32 %v488_v37, %v140_v51  ;;  %v183_v21 = vmax.f32 %v163_v18, 0.0 }
  0xc1   :  { %v174_v55 = vmax.f32 %v141_v52, 0.0  ;;  %v192_v22 = vpack.c.bf16 %v183_v21, %v182_v20 }
  0xc4   :  { %v165_v19 = vpop.f32.mrf.mxu3 }
  0xc5   :  { %v166_v24 = vadd.f32 %v488_v37, %v165_v19 }
  0xc6   :  { %v142_v53 = vpop.f32.mrf.mxu0 }
  0xc7   :  { %v143_v54 = vadd.f32 %v488_v37, %v142_v53  ;;  %v184_v26 = vmax.f32 %v166_v24, 0.0 }
  0xc9   :  { %v175_v56 = vmax.f32 %v143_v54, 0.0 }
  0xcb   :  { %v188_v57 = vpack.c.bf16 %v175_v56, %v174_v55 }
  0xcc   :  { %v167_v23 = vpop.f32.mrf.mxu3 }
  0xcd   :  { %459 = vmatmul.msk.bf16.gmra.mxu1 %vm230_vm0, %v188_v57  ;;  %v168_v25 = vadd.f32 %v488_v37, %v167_v23 }
  0xce   :  { %v145_v58 = vpop.f32.mrf.mxu0 }
  0xcf   :  { %v146_v59 = vadd.f32 %v488_v37, %v145_v58  ;;  %v185_v27 = vmax.f32 %v168_v25, 0.0 }
  0xd1   :  { %v176_v62 = vmax.f32 %v146_v59, 0.0  ;;  %v193_v28 = vpack.c.bf16 %v185_v27, %v184_v26 }
  0xd6   :  { %v147_v60 = vpop.f32.mrf.mxu0 }
  0xd7   :  { %v148_v61 = vadd.f32 %v488_v37, %v147_v60 }
  0xd9   :  { %v177_v63 = vmax.f32 %v148_v61, 0.0 }
  0xdb   :  { %v189_v0 = vpack.c.bf16 %v177_v63, %v176_v62 }
  0xdd   :  { %460 = vmatmul.msk.bf16.gmra.mxu1 %vm230_vm0, %v189_v0 }
  0xde   :  { %v150_v1 = vpop.f32.mrf.mxu0 }
  0xdf   :  { %v151_v3 = vadd.f32 %v488_v37, %v150_v1 }
  0xe1   :  { %v178_v7 = vmax.f32 %v151_v3, 0.0 }
  0xe6   :  { %v152_v4 = vpop.f32.mrf.mxu0 }
  0xe7   :  { %v153_v5 = vadd.f32 %v488_v37, %v152_v4 }
  0xe9   :  { %v179_v8 = vmax.f32 %v153_v5, 0.0 }
  0xeb   :  { %v190_v9 = vpack.c.bf16 %v179_v8, %v178_v7 }
  0xed   :  { %461 = vmatmul.msk.bf16.gmra.mxu1 %vm230_vm0, %v190_v9 }
  0xfd   :  { %462 = vmatmul.msk.bf16.gmra.mxu1 %vm230_vm0, %v191_v15 }
 0x10d   :  { %463 = vmatmul.msk.bf16.gmra.mxu1 %vm230_vm0, %v192_v22 }
 0x11d   :  { %464 = vmatmul.msk.bf16.gmra.mxu1 %vm230_vm0, %v193_v28 }
 0x12a   :  { %v264_v29 = vpop.f32.mrf.mxu1 }
 0x12b   :  { %v265_v31 = vadd.f32 %v489_v30, %v264_v29 }
 0x12d   :  { %v304_v34 = vmax.f32 %v265_v31, 0.0  ;;  %v371_v31 = vstv %s686_s6  ;;  %s400_s6 = sshll.u32 %s687_s7, 4  ;;  %s401_s6 = int_to_ptr.hbm [resolvable:$true] %s400_s6 }
 0x132   :  { %v266_v32 = vpop.f32.mrf.mxu1 }
 0x133   :  { %v267_v33 = vadd.f32 %v489_v30, %v266_v32 }
 0x135   :  { %v305_v35 = vmax.f32 %v267_v33, 0.0 }
 0x137   :  { %v659_v36 = vpack.c.bf16 %v305_v35, %v304_v34 }
 0x139   :  { %v334_v29 = vsel %vm329_vm1, %v659_v36, 0 }
 0x13a   :  { %v269_v38 = vpop.f32.mrf.mxu1 }
 0x13b   :  { %v270_v39 = vadd.f32 %v489_v30, %v269_v38 }
 0x13d   :  { %v306_v41 = vmax.f32 %v270_v39, 0.0 }
 0x142   :  { %v271_v37 = vpop.f32.mrf.mxu1 }
 0x143   :  { %v272_v40 = vadd.f32 %v489_v30, %v271_v37 }
 0x145   :  { %v307_v42 = vmax.f32 %v272_v40, 0.0 }
 0x147   :  { %v321_v43 = vpack.c.bf16 %v307_v42, %v306_v41 }
 0x149   :  { %v337_v28 = vsel %vm329_vm1, %v321_v43, 0 }
 0x14a   :  { %v274_v44 = vpop.f32.mrf.mxu1 }
 0x14b   :  { %v275_v45 = vadd.f32 %v489_v30, %v274_v44 }
 0x14d   :  { %v308_v48 = vmax.f32 %v275_v45, 0.0 }
 0x152   :  { %v276_v46 = vpop.f32.mrf.mxu1 }
 0x153   :  { %v277_v47 = vadd.f32 %v489_v30, %v276_v46 }
 0x155   :  { %v309_v49 = vmax.f32 %v277_v47, 0.0 }
 0x157   :  { %v322_v50 = vpack.c.bf16 %v309_v49, %v308_v48 }
 0x159   :  { %v340_v27 = vsel %vm329_vm1, %v322_v50, 0 }
 0x15a   :  { %v279_v51 = vpop.f32.mrf.mxu1 }
 0x15b   :  { %v280_v52 = vadd.f32 %v489_v30, %v279_v51 }
 0x15d   :  { %v310_v55 = vmax.f32 %v280_v52, 0.0 }
 0x162   :  { %v281_v53 = vpop.f32.mrf.mxu1 }
 0x163   :  { %v282_v54 = vadd.f32 %v489_v30, %v281_v53 }
 0x165   :  { %v311_v56 = vmax.f32 %v282_v54, 0.0 }
 0x167   :  { %v323_v57 = vpack.c.bf16 %v311_v56, %v310_v55 }
 0x169   :  { %v343_v26 = vsel %vm329_vm1, %v323_v57, 0 }
 0x16a   :  { %v284_v58 = vpop.f32.mrf.mxu1 }
 0x16b   :  { %v285_v59 = vadd.f32 %v489_v30, %v284_v58 }
 0x16d   :  { %v312_v62 = vmax.f32 %v285_v59, 0.0 }
 0x172   :  { %v286_v60 = vpop.f32.mrf.mxu1 }
 0x173   :  { %v287_v61 = vadd.f32 %v489_v30, %v286_v60 }
 0x175   :  { %v313_v63 = vmax.f32 %v287_v61, 0.0 }
 0x177   :  { %v324_v0 = vpack.c.bf16 %v313_v63, %v312_v62 }
 0x179   :  { %v346_v25 = vsel %vm329_vm1, %v324_v0, 0 }
 0x17a   :  { %v289_v1 = vpop.f32.mrf.mxu1 }
 0x17b   :  { %v290_v19 = vadd.f32 %v489_v30, %v289_v1 }
 0x17d   :  { %v314_v22 = vmax.f32 %v290_v19, 0.0 }
 0x182   :  { %v291_v2 = vpop.f32.mrf.mxu1 }
 0x183   :  { %v292_v17 = vadd.f32 %v489_v30, %v291_v2 }
 0x185   :  { %v315_v20 = vmax.f32 %v292_v17, 0.0 }
 0x187   :  { %v325_v23 = vpack.c.bf16 %v315_v20, %v314_v22 }
 0x189   :  { %v349_v24 = vsel %vm329_vm1, %v325_v23, 0 }
 0x18a   :  { %v294_v3 = vpop.f32.mrf.mxu1 }
 0x18b   :  { %v295_v12 = vadd.f32 %v489_v30, %v294_v3 }
 0x18d   :  { %v316_v16 = vmax.f32 %v295_v12, 0.0 }
 0x192   :  { %v296_v4 = vpop.f32.mrf.mxu1 }
 0x193   :  { %v297_v9 = vadd.f32 %v489_v30, %v296_v4 }
 0x195   :  { %v317_v14 = vmax.f32 %v297_v9, 0.0 }
 0x197   :  { %v326_v18 = vpack.c.bf16 %v317_v14, %v316_v16 }
 0x199   :  { %v352_v21 = vsel %vm329_vm1, %v326_v18, 0 }
 0x19a   :  { %v299_v5 = vpop.f32.mrf.mxu1 }
 0x19b   :  { %v300_v6 = vadd.f32 %v489_v30, %v299_v5 }
 0x19d   :  { %v318_v10 = vmax.f32 %v300_v6, 0.0 }
 0x1a2   :  { %v301_v7 = vpop.f32.mrf.mxu1 }
 0x1a3   :  { %v302_v8 = vadd.f32 %v489_v30, %v301_v7  ;;  %v328_v30 = vld [vmem:[%s685_s5] sm:$0xf]  ;;  %s520_s5 = smov [#allocation3]  }
 0x1a4   :  { %s398_s13 = sshll.u32 %s520_s5, 4  ;;  %s399_s13 = int_to_ptr.vmem [resolvable:$true] %s398_s13 }
 0x1a5   :  { %v319_v11 = vmax.f32 %v302_v8, 0.0 }
 0x1a7   :  { %v327_v13 = vpack.c.bf16 %v319_v11, %v318_v10 }
 0x1a9   :  { %v355_v15 = vsel %vm329_vm1, %v327_v13, 0 }
 0x1aa   :  { %357 = vmatpush.bf16.xpose.msra.mxu2 %v355_v15 }
 0x1b2   :  { %358 = vmatpush.bf16.xpose.msra.mxu2 %v352_v21 }
 0x1ba   :  { %359 = vmatpush.bf16.xpose.msra.mxu2 %v349_v24 }
 0x1c2   :  { %360 = vmatpush.bf16.xpose.msra.mxu2 %v346_v25 }
 0x1ca   :  { %361 = vmatpush.bf16.xpose.msra.mxu2 %v343_v26 }
 0x1d2   :  { %362 = vmatpush.bf16.xpose.msra.mxu2 %v340_v27 }
 0x1da   :  { %363 = vmatpush.bf16.xpose.msra.mxu2 %v337_v28 }
 0x1e2   :  { %364 = vmatpush.bf16.xpose.msra.mxu2 %v334_v29 }
 0x1e9   :  { %465 = vmatmul.msk.bf16.vlgmr.msra.gmra.mxu2 %vm329_vm1, %v328_v30 }
 0x26c   :  { %v366_v32 = vpop.f32.mrf.mxu2 }
 0x26d   :  { %v372_v33 = vadd.f32 %v371_v31, %v366_v32 }
 0x26f   :  { %v466_v34 = vmul.f32 -1.442695, %v372_v33 }
 0x271   :  { %490 = vpow2.f32 %v466_v34 }
 0x274   :  { %v368_v35 = vpop.f32.mrf.mxu2 }
 0x277   :  { %v491_v38 = vpop.eup %490 }
 0x278   :  { %v376_v39 = vadd.f32 1.0, %v491_v38 }
 0x27a   :  { %492 = vrcp.f32 %v376_v39  ;;  %v388_v41 = vand.u32 2147483648, %v376_v39  ;;  %v386_v43 = vand.u32 2147483647, %v376_v39  ;;  %vm382_vm3 = vweird.f32 %v376_v39 }
 0x27c   :  { %v389_v45 = vor.u32 1.1754944e-38, %v388_v41  ;;  %vm387_vm5 = vcmp.eq.f32.partialorder %v386_v43, 8.507059e+37 }
 0x280   :  { %v493_v36 = vpop.eup %492 }
 0x281   :  { %v378_v37 = vmul.f32 %v493_v36, %v376_v39  ;;  %vm383_vm2 = vweird.f32 %v493_v36 }
 0x282   :  { %vm384_vm4 = vmor %vm382_vm3, %vm383_vm2 }
 0x283   :  { %v379_v40 = vsub.f32 1.0, %v378_v37 }
 0x285   :  { %v380_v42 = vmul.f32 %v493_v36, %v379_v40 }
 0x287   :  { %v381_v44 = vadd.f32 %v493_v36, %v380_v42 }
 0x289   :  { %v385_v46 = vsel %vm384_vm4, %v493_v36, %v381_v44 }
 0x28a   :  { %v390_v47 = vsel %vm387_vm5, %v389_v45, %v385_v46 }
 0x28b   :  { %392 = vst [vmem:[#allocation3] sm:$0x1] %v390_v47 }
 0x28c   :  { %403 = dma.vmem_to_hbm [thread:$0]  %s399_s13, 16, %s401_s6, [#allocation4]  }
 0x28d   :  { %518 = dma.done.wait [#allocation4], 16  }
 0x28e   :  { %519 = vsyncadd [#allocation4], 4294967280 }
 0x28f   :  { %408 = vsyncpa [#allocation4], 1 }

</bundles_post_ra>
